<compile_context>
chip_gen: v7x
topology: tpu7x:2x2x1
jax: 0.10.0
libtpu: 0.0.40
codegen_flags: <defaults>
</compile_context>

<pallas_src>
import math

import jax
import jax.numpy as jnp
from jax.experimental import pallas as pl
from jax.experimental.pallas import tpu as pltpu


VMEM_LIMIT_BYTES = 32 * 1024 * 1024   # explicit scoped-VMEM ceiling (fits v5e/v6e/v7x)


def _pick_tile(n, candidates):
    for c in candidates:
        if c <= n and n % c == 0:
            return c
    return n                                     # fall back to full dim


# --------------------------------------------------------------------------
# Kernel 1: fused QKV projection with head-major output.
#   x:(tm, D) @ w:(D, cols) + b:(1, cols)  ->  o:(chunks, H, tm, Dh)
#   where cols == chunks * H * Dh and columns are ordered [q | k | v],
#   each of which is head-contiguous (head h owns cols h*Dh:(h+1)*Dh).
# --------------------------------------------------------------------------
def _qkv_proj_kernel(x_ref, w_ref, b_ref, o_ref):
    x = x_ref[...].astype(jnp.bfloat16)
    acc = jnp.dot(x, w_ref[...], preferred_element_type=jnp.float32)
    acc = acc + b_ref[...]
    chunks, num_heads, _, head_dim = o_ref.shape
    # Head-major re-layout happens here (static lane slices + sub-view stores)
    # instead of three standalone XLA transposes in the wrapper.
    for c in range(chunks):
        for h in range(num_heads):
            start = (c * num_heads + h) * head_dim
            o_ref[c, h, :, :] = acc[:, start:start + head_dim].astype(o_ref.dtype)


def _qkv_projection(x, w_qkv, b_qkv, num_heads, head_dim):
    S, D = x.shape
    cols = w_qkv.shape[1]                        # 3 * D
    tm = _pick_tile(S, (512, 256, 128, 64, 32, 16, 8))

    if D % 128 == 0:
        # Stream the weight one q/k/v chunk (D columns) per outer step.
        grid = (3, S // tm)
        in_specs = [
            pl.BlockSpec((tm, D), lambda n, i: (i, 0)),
            pl.BlockSpec((D, D), lambda n, i: (0, n)),
            pl.BlockSpec((1, D), lambda n, i: (0, n)),
        ]
        out_specs = pl.BlockSpec((1, num_heads, tm, head_dim),
                                 lambda n, i: (n, 0, i, 0))
        dims = ("parallel", "parallel")
    else:
        # Small D (e.g. the test shapes): keep the whole (D, 3D) weight as one
        # block (tiny, so the double-buffer cost is negligible).
        grid = (S // tm,)
        in_specs = [
            pl.BlockSpec((tm, D), lambda i: (i, 0)),
            pl.BlockSpec((D, cols), lambda i: (0, 0)),
            pl.BlockSpec((1, cols), lambda i: (0, 0)),
        ]
        out_specs = pl.BlockSpec((3, num_heads, tm, head_dim),
                                 lambda i: (0, 0, i, 0))
        dims = ("parallel",)

    return pl.pallas_call(
        _qkv_proj_kernel,
        out_shape=jax.ShapeDtypeStruct((3, num_heads, S, head_dim), jnp.bfloat16),
        grid=grid,
        in_specs=in_specs,
        out_specs=out_specs,
        compiler_params=pltpu.CompilerParams(
            dimension_semantics=dims,
            vmem_limit_bytes=VMEM_LIMIT_BYTES),
    )(x, w_qkv, b_qkv)


# --------------------------------------------------------------------------
# Kernel 2: flash attention with online softmax.
#   grid = (H, S // tq, S // tk); k-axis is the reduction ("arbitrary") axis.
#   mask_mode: "none" | "row" (resident (1, S) key mask) | "dense" ((tq, tk))
# --------------------------------------------------------------------------
def _make_flash_kernel(mask_mode, tk, seq_len):
    def _body(q_ref, k_ref, v_ref, mask_ref, o_ref, m_sc, l_sc, acc_sc):
        ki = pl.program_id(2)

        @pl.when(ki == 0)
        def _init():
            m_sc[...] = jnp.full_like(m_sc, -jnp.inf)
            l_sc[...] = jnp.zeros_like(l_sc)
            acc_sc[...] = jnp.zeros_like(acc_sc)

        q = q_ref[...]                           # (tq, Dh) bf16, pre-scaled
        k = k_ref[...]                           # (tk, Dh) bf16
        v = v_ref[...]                           # (tk, Dh) bf16

        # Contract last axes of both operands (no explicit k.T).
        s = jax.lax.dot_general(q, k, (((1,), (1,)), ((), ())),
                                preferred_element_type=jnp.float32)   # (tq, tk)

        if mask_mode == "row":
            if tk == seq_len:
                s = s + mask_ref[...]
            else:
                start = pl.multiple_of(ki * tk, tk)
                s = s + mask_ref[:, pl.ds(start, tk)]
        elif mask_mode == "dense":
            s = s + mask_ref[...]

        m_prev = m_sc[...]
        m_new = jnp.maximum(m_prev, jnp.max(s, axis=-1, keepdims=True))
        alpha = jnp.exp(m_prev - m_new)                        # f32 rescale
        p = jnp.exp((s - m_new).astype(jnp.bfloat16))          # bf16 exp (EUP)
        l_sc[...] = alpha * l_sc[...] + jnp.sum(
            p.astype(jnp.float32), axis=-1, keepdims=True)     # f32 row-sum
        acc_sc[...] = alpha * acc_sc[...] + jnp.dot(
            p, v, preferred_element_type=jnp.float32)
        m_sc[...] = m_new

        @pl.when(ki == pl.num_programs(2) - 1)
        def _finalize():
            inv_l = pl.reciprocal(l_sc[...], approx=True)      # EUP, not VALU
            o_ref[...] = (acc_sc[...] * inv_l).astype(o_ref.dtype)

    if mask_mode == "none":
        def kernel(q_ref, k_ref, v_ref, o_ref, m_sc, l_sc, acc_sc):
            _body(q_ref, k_ref, v_ref, None, o_ref, m_sc, l_sc, acc_sc)
        return kernel
    return _body


def _flash_attention(qkv_hm, mask, mask_mode, out_dtype):
    _, H, S, Dh = qkv_hm.shape
    D = H * Dh

    tq = _pick_tile(S, (512, 256, 128, 64, 32, 16, 8))   # large q tile: K/V re-read ~ S/tq
    tk = _pick_tile(S, (256, 128))                        # capped for v5e EUP / v7x VMEM

    q_spec = pl.BlockSpec((None, None, tq, Dh), lambda h, qi, ki: (0, h, qi, 0))
    k_spec = pl.BlockSpec((None, None, tk, Dh), lambda h, qi, ki: (1, h, ki, 0))
    v_spec = pl.BlockSpec((None, None, tk, Dh), lambda h, qi, ki: (2, h, ki, 0))

    in_specs = [q_spec, k_spec, v_spec]
    args = [qkv_hm, qkv_hm, qkv_hm]
    if mask_mode == "row":
        # Whole key-mask resident (index_map never changes); sliced in-kernel.
        in_specs.append(pl.BlockSpec((1, S), lambda h, qi, ki: (0, 0)))
        args.append(mask)
    elif mask_mode == "dense":
        in_specs.append(pl.BlockSpec((tq, tk), lambda h, qi, ki: (qi, ki)))
        args.append(mask)

    lane_dense = (Dh % 128 == 0)
    if lane_dense:
        # Write straight into the (S, D) slab: no post-kernel transpose.
        out_shape = jax.ShapeDtypeStruct((S, D), out_dtype)
        o_spec = pl.BlockSpec((tq, Dh), lambda h, qi, ki: (qi, h))
    else:
        out_shape = jax.ShapeDtypeStruct((H, S, Dh), out_dtype)
        o_spec = pl.BlockSpec((None, tq, Dh), lambda h, qi, ki: (h, qi, 0))

    out = pl.pallas_call(
        _make_flash_kernel(mask_mode, tk, S),
        out_shape=out_shape,
        grid=(H, S // tq, S // tk),
        in_specs=in_specs,
        out_specs=o_spec,
        scratch_shapes=[
            pltpu.VMEM((tq, 1), jnp.float32),    # running max
            pltpu.VMEM((tq, 1), jnp.float32),    # running denom
            pltpu.VMEM((tq, Dh), jnp.float32),   # f32 accumulator
        ],
        compiler_params=pltpu.CompilerParams(
            dimension_semantics=("parallel", "parallel", "arbitrary"),
            vmem_limit_bytes=VMEM_LIMIT_BYTES),
    )(*args)

    if lane_dense:
        return out                               # already (S, D)
    return out.transpose(1, 0, 2).reshape(S, D)  # heads -> feature axis


# --------------------------------------------------------------------------
# Wrapper: RandomizedBertSelfAttention.forward (batch == 1 as in the module)
# --------------------------------------------------------------------------
def bert_self_attention(hidden_states, params, attention_mask=None,
                        *, num_heads):
    """hidden_states: (1, S, D).  Returns context_layer of shape (1, S, D)."""
    assert hidden_states.shape[0] == 1, "module semantics require batch == 1"
    _, S, D = hidden_states.shape
    H = num_heads
    Dh = D // H
    assert Dh * H == D
    in_dtype = hidden_states.dtype

    x = hidden_states[0]                         # (S, D) — squeeze(dim=0)

    # ---- pack & pre-scale projection params (one-time glue) ---------------
    scale = 1.0 / math.sqrt(Dh)
    wq_t = params["wq"].T * scale                # fold 1/sqrt(Dh) into Q proj
    wk_t = params["wk"].T
    wv_t = params["wv"].T
    w_qkv = jnp.concatenate([wq_t, wk_t, wv_t], axis=1).astype(jnp.bfloat16)
    b_qkv = jnp.concatenate(
        [params["bq"] * scale, params["bk"], params["bv"]]
    ).reshape(1, 3 * D).astype(jnp.float32)

    # ---- fused QKV projection -> head-major (3, H, S, Dh) bf16 ------------
    qkv_hm = _qkv_projection(x, w_qkv, b_qkv, H, Dh)

    # ---- additive attention mask in its natural (un-broadcast) form -------
    if attention_mask is None:
        mask, mask_mode = None, "none"
    else:
        mask = jnp.asarray(attention_mask, jnp.float32)
        mask = mask.reshape(mask.shape[-2:])     # (1,S) key mask or (S,S)
        mask = jnp.maximum(mask, jnp.float32(-1e30))   # guard against -inf -> NaN
        mq = mask.shape[0]
        assert mask.shape[-1] == S and mq in (1, S)
        mask_mode = "row" if mq == 1 else "dense"

    # ---- flash attention over (head, q-block, k-block) --------------------
    context = _flash_attention(qkv_hm, mask, mask_mode, in_dtype)   # (S, D)
    return context[None, :, :]                   # unsqueeze(dim=0)


# --------------------------------------------------------------------------
# Pure-JAX reference (exact value of the randomized op's expectation)
# --------------------------------------------------------------------------
def _reference(hidden_states, params, attention_mask, num_heads):
    _, S, D = hidden_states.shape
    Dh = D // num_heads
    x = hidden_states[0]
    q = x @ params["wq"].T + params["bq"]
    k = x @ params["wk"].T + params["bk"]
    v = x @ params["wv"].T + params["bv"]
    q = q.reshape(S, num_heads, Dh).transpose(1, 0, 2)
    k = k.reshape(S, num_heads, Dh).transpose(1, 0, 2)
    v = v.reshape(S, num_heads, Dh).transpose(1, 0, 2)
    scores = jnp.einsum("hqd,hkd->hqk", q, k) / math.sqrt(Dh)
    if attention_mask is not None:
        m = attention_mask.reshape(attention_mask.shape[-2:])
        scores = scores + m[None]
    probs = jax.nn.softmax(scores, axis=-1)
    ctx = jnp.einsum("hqk,hkd->hqd", probs, v)
    ctx = ctx.transpose(1, 0, 2).reshape(S, D)
    return ctx[None]


if __name__ == "__main__":
    S, D, H = 8, 32, 4        # seq len, hidden size, num attention heads

    key = jax.random.PRNGKey(0)
    k_x, k_wq, k_wk, k_wv, k_bq, k_bk, k_bv = jax.random.split(key, 7)

    hidden_states = jax.random.normal(k_x, (1, S, D), jnp.float32)
    params = {
        "wq": 0.02 * jax.random.normal(k_wq, (D, D), jnp.float32),
        "wk": 0.02 * jax.random.normal(k_wk, (D, D), jnp.float32),
        "wv": 0.02 * jax.random.normal(k_wv, (D, D), jnp.float32),
        "bq": 0.01 * jax.random.normal(k_bq, (D,), jnp.float32),
        "bk": 0.01 * jax.random.normal(k_bk, (D,), jnp.float32),
        "bv": 0.01 * jax.random.normal(k_bv, (D,), jnp.float32),
    }
    # BERT-style additive key-padding mask: mask out the last two keys.
    mask_row = jnp.concatenate(
        [jnp.zeros((S - 2,), jnp.float32), jnp.full((2,), -10000.0, jnp.float32)])
    attention_mask = mask_row.reshape(1, 1, 1, S)

    out = bert_self_attention(hidden_states, params, attention_mask,
                              num_heads=H)
    out = jax.block_until_ready(out)

    ref = _reference(hidden_states, params, attention_mask, H)
    assert out.shape == (1, S, D)
    # bf16 MXU operands / bf16 exp (f32 stats & accumulation) -> loosened tol.
    assert jnp.allclose(out, ref, atol=1e-2, rtol=1e-2), "mismatch vs reference"

    print("KERNEL_OK")
</pallas_src>

<mosaic_0001>
module attributes {stable_mosaic.version = 11 : i64} {
  func.func @_qkv_proj_kernel(%arg0: i32, %arg1: memref<8x32xf32, #tpu.memory_space<vmem>>, %arg2: memref<32x96xbf16, #tpu.memory_space<vmem>>, %arg3: memref<1x96xf32, #tpu.memory_space<vmem>>, %arg4: memref<3x4x8x8xbf16, #tpu.memory_space<vmem>>) attributes {dimension_semantics = [#tpu.dimension_semantics<parallel>], iteration_bounds = array<i64: 1>, scalar_prefetch = 0 : i64, scratch_operands = 0 : i64, tpu.core_type = #tpu.core_type<tc>, window_params = [{transform_indices = @transform_0, window_bounds = array<i64: 8, 32>}, {pipeline_mode = #tpu.pipeline_mode<synchronous>, transform_indices = @transform_1, window_bounds = array<i64: 32, 96>}, {pipeline_mode = #tpu.pipeline_mode<synchronous>, transform_indices = @transform_2, window_bounds = array<i64: 1, 96>}, {transform_indices = @transform_3, window_bounds = array<i64: 3, 4, 8, 8>}]} {
    %c0 = arith.constant 0 : index
    %c0_0 = arith.constant 0 : index
    %0 = vector.load %arg1[%c0, %c0_0] : memref<8x32xf32, #tpu.memory_space<vmem>>, vector<8x32xf32>
    %1 = arith.truncf %0 : vector<8x32xf32> to vector<8x32xbf16>
    %c0_1 = arith.constant 0 : index
    %c0_2 = arith.constant 0 : index
    %2 = vector.load %arg2[%c0_1, %c0_2] : memref<32x96xbf16, #tpu.memory_space<vmem>>, vector<32x96xbf16>
    %cst = arith.constant dense<0.000000e+00> : vector<8x96xf32>
    %3 = tpu.matmul %1, %2, %cst {dimension_numbers = #tpu.dot_dimension_numbers<[1], [0], [0], [1], [0, 0, 1, 1], [], []>} : vector<8x32xbf16>, vector<32x96xbf16>, vector<8x96xf32> -> vector<8x96xf32>
    %c0_3 = arith.constant 0 : index
    %c0_4 = arith.constant 0 : index
    %4 = vector.load %arg3[%c0_3, %c0_4] : memref<1x96xf32, #tpu.memory_space<vmem>>, vector<1x96xf32>
    %5 = vector.broadcast %4 : vector<1x96xf32> to vector<8x96xf32>
    %6 = arith.addf %3, %5 : vector<8x96xf32>
    %7 = vector.extract_strided_slice %6 {offsets = [0, 0], sizes = [8, 8], strides = [1, 1]} : vector<8x96xf32> to vector<8x8xf32>
    %8 = arith.truncf %7 : vector<8x8xf32> to vector<8x8xbf16>
    %c0_5 = arith.constant 0 : index
    %c0_6 = arith.constant 0 : index
    %c0_7 = arith.constant 0 : index
    %c0_8 = arith.constant 0 : index
    %9 = vector.load %arg4[%c0_5, %c0_6, %c0_7, %c0_8] : memref<3x4x8x8xbf16, #tpu.memory_space<vmem>>, vector<1x1x8x8xbf16>
    %10 = vector.shape_cast %9 : vector<1x1x8x8xbf16> to vector<8x8xbf16>
    %11 = vector.shape_cast %8 : vector<8x8xbf16> to vector<1x1x8x8xbf16>
    tpu.vector_store %arg4[%c0_5, %c0_6, %c0_7, %c0_8], %11 {strides = array<i32>} : memref<3x4x8x8xbf16, #tpu.memory_space<vmem>>, vector<1x1x8x8xbf16>,
    %12 = vector.extract_strided_slice %6 {offsets = [0, 8], sizes = [8, 8], strides = [1, 1]} : vector<8x96xf32> to vector<8x8xf32>
    %13 = arith.truncf %12 : vector<8x8xf32> to vector<8x8xbf16>
    %c0_9 = arith.constant 0 : index
    %c1 = arith.constant 1 : index
    %c0_10 = arith.constant 0 : index
    %c0_11 = arith.constant 0 : index
    %14 = vector.load %arg4[%c0_9, %c1, %c0_10, %c0_11] : memref<3x4x8x8xbf16, #tpu.memory_space<vmem>>, vector<1x1x8x8xbf16>
    %15 = vector.shape_cast %14 : vector<1x1x8x8xbf16> to vector<8x8xbf16>
    %16 = vector.shape_cast %13 : vector<8x8xbf16> to vector<1x1x8x8xbf16>
    tpu.vector_store %arg4[%c0_9, %c1, %c0_10, %c0_11], %16 {strides = array<i32>} : memref<3x4x8x8xbf16, #tpu.memory_space<vmem>>, vector<1x1x8x8xbf16>,
    %17 = vector.extract_strided_slice %6 {offsets = [0, 16], sizes = [8, 8], strides = [1, 1]} : vector<8x96xf32> to vector<8x8xf32>
    %18 = arith.truncf %17 : vector<8x8xf32> to vector<8x8xbf16>
    %c0_12 = arith.constant 0 : index
    %c2 = arith.constant 2 : index
    %c0_13 = arith.constant 0 : index
    %c0_14 = arith.constant 0 : index
    %19 = vector.load %arg4[%c0_12, %c2, %c0_13, %c0_14] : memref<3x4x8x8xbf16, #tpu.memory_space<vmem>>, vector<1x1x8x8xbf16>
    %20 = vector.shape_cast %19 : vector<1x1x8x8xbf16> to vector<8x8xbf16>
    %21 = vector.shape_cast %18 : vector<8x8xbf16> to vector<1x1x8x8xbf16>
    tpu.vector_store %arg4[%c0_12, %c2, %c0_13, %c0_14], %21 {strides = array<i32>} : memref<3x4x8x8xbf16, #tpu.memory_space<vmem>>, vector<1x1x8x8xbf16>,
    %22 = vector.extract_strided_slice %6 {offsets = [0, 24], sizes = [8, 8], strides = [1, 1]} : vector<8x96xf32> to vector<8x8xf32>
    %23 = arith.truncf %22 : vector<8x8xf32> to vector<8x8xbf16>
    %c0_15 = arith.constant 0 : index
    %c3 = arith.constant 3 : index
    %c0_16 = arith.constant 0 : index
    %c0_17 = arith.constant 0 : index
    %24 = vector.load %arg4[%c0_15, %c3, %c0_16, %c0_17] : memref<3x4x8x8xbf16, #tpu.memory_space<vmem>>, vector<1x1x8x8xbf16>
    %25 = vector.shape_cast %24 : vector<1x1x8x8xbf16> to vector<8x8xbf16>
    %26 = vector.shape_cast %23 : vector<8x8xbf16> to vector<1x1x8x8xbf16>
    tpu.vector_store %arg4[%c0_15, %c3, %c0_16, %c0_17], %26 {strides = array<i32>} : memref<3x4x8x8xbf16, #tpu.memory_space<vmem>>, vector<1x1x8x8xbf16>,
    %27 = vector.extract_strided_slice %6 {offsets = [0, 32], sizes = [8, 8], strides = [1, 1]} : vector<8x96xf32> to vector<8x8xf32>
    %28 = arith.truncf %27 : vector<8x8xf32> to vector<8x8xbf16>
    %c1_18 = arith.constant 1 : index
    %c0_19 = arith.constant 0 : index
    %c0_20 = arith.constant 0 : index
    %c0_21 = arith.constant 0 : index
    %29 = vector.load %arg4[%c1_18, %c0_19, %c0_20, %c0_21] : memref<3x4x8x8xbf16, #tpu.memory_space<vmem>>, vector<1x1x8x8xbf16>
    %30 = vector.shape_cast %29 : vector<1x1x8x8xbf16> to vector<8x8xbf16>
    %31 = vector.shape_cast %28 : vector<8x8xbf16> to vector<1x1x8x8xbf16>
    tpu.vector_store %arg4[%c1_18, %c0_19, %c0_20, %c0_21], %31 {strides = array<i32>} : memref<3x4x8x8xbf16, #tpu.memory_space<vmem>>, vector<1x1x8x8xbf16>,
    %32 = vector.extract_strided_slice %6 {offsets = [0, 40], sizes = [8, 8], strides = [1, 1]} : vector<8x96xf32> to vector<8x8xf32>
    %33 = arith.truncf %32 : vector<8x8xf32> to vector<8x8xbf16>
    %c1_22 = arith.constant 1 : index
    %c1_23 = arith.constant 1 : index
    %c0_24 = arith.constant 0 : index
    %c0_25 = arith.constant 0 : index
    %34 = vector.load %arg4[%c1_22, %c1_23, %c0_24, %c0_25] : memref<3x4x8x8xbf16, #tpu.memory_space<vmem>>, vector<1x1x8x8xbf16>
    %35 = vector.shape_cast %34 : vector<1x1x8x8xbf16> to vector<8x8xbf16>
    %36 = vector.shape_cast %33 : vector<8x8xbf16> to vector<1x1x8x8xbf16>
    tpu.vector_store %arg4[%c1_22, %c1_23, %c0_24, %c0_25], %36 {strides = array<i32>} : memref<3x4x8x8xbf16, #tpu.memory_space<vmem>>, vector<1x1x8x8xbf16>,
    %37 = vector.extract_strided_slice %6 {offsets = [0, 48], sizes = [8, 8], strides = [1, 1]} : vector<8x96xf32> to vector<8x8xf32>
    %38 = arith.truncf %37 : vector<8x8xf32> to vector<8x8xbf16>
    %c1_26 = arith.constant 1 : index
    %c2_27 = arith.constant 2 : index
    %c0_28 = arith.constant 0 : index
    %c0_29 = arith.constant 0 : index
    %39 = vector.load %arg4[%c1_26, %c2_27, %c0_28, %c0_29] : memref<3x4x8x8xbf16, #tpu.memory_space<vmem>>, vector<1x1x8x8xbf16>
    %40 = vector.shape_cast %39 : vector<1x1x8x8xbf16> to vector<8x8xbf16>
    %41 = vector.shape_cast %38 : vector<8x8xbf16> to vector<1x1x8x8xbf16>
    tpu.vector_store %arg4[%c1_26, %c2_27, %c0_28, %c0_29], %41 {strides = array<i32>} : memref<3x4x8x8xbf16, #tpu.memory_space<vmem>>, vector<1x1x8x8xbf16>,
    %42 = vector.extract_strided_slice %6 {offsets = [0, 56], sizes = [8, 8], strides = [1, 1]} : vector<8x96xf32> to vector<8x8xf32>
    %43 = arith.truncf %42 : vector<8x8xf32> to vector<8x8xbf16>
    %c1_30 = arith.constant 1 : index
    %c3_31 = arith.constant 3 : index
    %c0_32 = arith.constant 0 : index
    %c0_33 = arith.constant 0 : index
    %44 = vector.load %arg4[%c1_30, %c3_31, %c0_32, %c0_33] : memref<3x4x8x8xbf16, #tpu.memory_space<vmem>>, vector<1x1x8x8xbf16>
    %45 = vector.shape_cast %44 : vector<1x1x8x8xbf16> to vector<8x8xbf16>
    %46 = vector.shape_cast %43 : vector<8x8xbf16> to vector<1x1x8x8xbf16>
    tpu.vector_store %arg4[%c1_30, %c3_31, %c0_32, %c0_33], %46 {strides = array<i32>} : memref<3x4x8x8xbf16, #tpu.memory_space<vmem>>, vector<1x1x8x8xbf16>,
    %47 = vector.extract_strided_slice %6 {offsets = [0, 64], sizes = [8, 8], strides = [1, 1]} : vector<8x96xf32> to vector<8x8xf32>
    %48 = arith.truncf %47 : vector<8x8xf32> to vector<8x8xbf16>
    %c2_34 = arith.constant 2 : index
    %c0_35 = arith.constant 0 : index
    %c0_36 = arith.constant 0 : index
    %c0_37 = arith.constant 0 : index
    %49 = vector.load %arg4[%c2_34, %c0_35, %c0_36, %c0_37] : memref<3x4x8x8xbf16, #tpu.memory_space<vmem>>, vector<1x1x8x8xbf16>
    %50 = vector.shape_cast %49 : vector<1x1x8x8xbf16> to vector<8x8xbf16>
    %51 = vector.shape_cast %48 : vector<8x8xbf16> to vector<1x1x8x8xbf16>
    tpu.vector_store %arg4[%c2_34, %c0_35, %c0_36, %c0_37], %51 {strides = array<i32>} : memref<3x4x8x8xbf16, #tpu.memory_space<vmem>>, vector<1x1x8x8xbf16>,
    %52 = vector.extract_strided_slice %6 {offsets = [0, 72], sizes = [8, 8], strides = [1, 1]} : vector<8x96xf32> to vector<8x8xf32>
    %53 = arith.truncf %52 : vector<8x8xf32> to vector<8x8xbf16>
    %c2_38 = arith.constant 2 : index
    %c1_39 = arith.constant 1 : index
    %c0_40 = arith.constant 0 : index
    %c0_41 = arith.constant 0 : index
    %54 = vector.load %arg4[%c2_38, %c1_39, %c0_40, %c0_41] : memref<3x4x8x8xbf16, #tpu.memory_space<vmem>>, vector<1x1x8x8xbf16>
    %55 = vector.shape_cast %54 : vector<1x1x8x8xbf16> to vector<8x8xbf16>
    %56 = vector.shape_cast %53 : vector<8x8xbf16> to vector<1x1x8x8xbf16>
    tpu.vector_store %arg4[%c2_38, %c1_39, %c0_40, %c0_41], %56 {strides = array<i32>} : memref<3x4x8x8xbf16, #tpu.memory_space<vmem>>, vector<1x1x8x8xbf16>,
    %57 = vector.extract_strided_slice %6 {offsets = [0, 80], sizes = [8, 8], strides = [1, 1]} : vector<8x96xf32> to vector<8x8xf32>
    %58 = arith.truncf %57 : vector<8x8xf32> to vector<8x8xbf16>
    %c2_42 = arith.constant 2 : index
    %c2_43 = arith.constant 2 : index
    %c0_44 = arith.constant 0 : index
    %c0_45 = arith.constant 0 : index
    %59 = vector.load %arg4[%c2_42, %c2_43, %c0_44, %c0_45] : memref<3x4x8x8xbf16, #tpu.memory_space<vmem>>, vector<1x1x8x8xbf16>
    %60 = vector.shape_cast %59 : vector<1x1x8x8xbf16> to vector<8x8xbf16>
    %61 = vector.shape_cast %58 : vector<8x8xbf16> to vector<1x1x8x8xbf16>
    tpu.vector_store %arg4[%c2_42, %c2_43, %c0_44, %c0_45], %61 {strides = array<i32>} : memref<3x4x8x8xbf16, #tpu.memory_space<vmem>>, vector<1x1x8x8xbf16>,
    %62 = vector.extract_strided_slice %6 {offsets = [0, 88], sizes = [8, 8], strides = [1, 1]} : vector<8x96xf32> to vector<8x8xf32>
    %63 = arith.truncf %62 : vector<8x8xf32> to vector<8x8xbf16>
    %c2_46 = arith.constant 2 : index
    %c3_47 = arith.constant 3 : index
    %c0_48 = arith.constant 0 : index
    %c0_49 = arith.constant 0 : index
    %64 = vector.load %arg4[%c2_46, %c3_47, %c0_48, %c0_49] : memref<3x4x8x8xbf16, #tpu.memory_space<vmem>>, vector<1x1x8x8xbf16>
    %65 = vector.shape_cast %64 : vector<1x1x8x8xbf16> to vector<8x8xbf16>
    %66 = vector.shape_cast %63 : vector<8x8xbf16> to vector<1x1x8x8xbf16>
    tpu.vector_store %arg4[%c2_46, %c3_47, %c0_48, %c0_49], %66 {strides = array<i32>} : memref<3x4x8x8xbf16, #tpu.memory_space<vmem>>, vector<1x1x8x8xbf16>,
    return
  }
  func.func @transform_0(%arg0: i32) -> (i32, i32) {
    %c0_i32 = arith.constant 0 : i32
    %c0_i32_0 = arith.constant 0 : i32
    return %arg0, %c0_i32 : i32, i32
  }
  func.func @transform_1(%arg0: i32) -> (i32, i32) {
    %c0_i32 = arith.constant 0 : i32
    %c0_i32_0 = arith.constant 0 : i32
    %c0_i32_1 = arith.constant 0 : i32
    return %c0_i32, %c0_i32_0 : i32, i32
  }
  func.func @transform_2(%arg0: i32) -> (i32, i32) {
    %c0_i32 = arith.constant 0 : i32
    %c0_i32_0 = arith.constant 0 : i32
    %c0_i32_1 = arith.constant 0 : i32
    return %c0_i32, %c0_i32_0 : i32, i32
  }
  func.func @transform_3(%arg0: i32) -> (i32, i32, i32, i32) {
    %c0_i32 = arith.constant 0 : i32
    %c0_i32_0 = arith.constant 0 : i32
    %c0_i32_1 = arith.constant 0 : i32
    %c0_i32_2 = arith.constant 0 : i32
    return %c0_i32, %c0_i32_0, %arg0, %c0_i32_1 : i32, i32, i32, i32
  }
}

</mosaic_0001>

<bundles_post_ra>
// kernel: tpu_custom_call.1
= control target key start
LH: loop header
LB: loop body
LE: loop exit
PB: predicated region body
PF: predicated region fallthrough
CT: control target
= control target key end

     0   :  { %8 = vsyncpa [#allocation3], 0  ;;  %s400_s0 = inlined_call_operand.hbm [shape: f32[8,32], index: 0, kind: input, shape index: {}]   ;;  %s401_s1 = inlined_call_operand.hbm [shape: bf16[32,96], index: 1, kind: input, shape index: {}]   ;;  %s402_s2 = inlined_call_operand.vmem [shape: f32[1,96], index: 2, kind: input, shape index: {}]   ;;  %s403_s3 = inlined_call_operand.hbm [shape: bf16[3,4,8,8], index: 3, kind: output, shape index: {}]  }
   0x1   :  { %9 = vsyncpa [#allocation6], 0 }
   0x2   :  { %10 = vsyncpa [#allocation4], 0  ;;  %s298_s12 = smov [#allocation2]   ;;  %s299_s14 = smov [#allocation5]  }
   0x3   :  { %s17_s13 = sshll.u32 %s298_s12, 4  ;;  %s26_s15 = sshll.u32 %s299_s14, 4  ;;  %s18_s13 = int_to_ptr.vmem [resolvable:$true] %s17_s13  ;;  %s335_s15 = int_to_ptr.vmem [resolvable:$true] %s26_s15 }
   0x4   :  { %s226_s18 = scalar_lea.hbm %s400_s0, 128 }
   0x5   :  { %p227_p0 = scmp.ne.s32.totalorder %s400_s0, %s226_s18  ;;  %p230_p1 = scmp.lt.u32.totalorder %s226_s18, %s400_s0 }
   0x7   :  { %p232_p2 = pnand %p230_p1, %p227_p0 }
   0x9   :  { %235 = shalt.err (!%p232_p2)
}
   0xa   :  { %s236_s23 = scalar_lea.vmem %s18_s13, 128  ;;  %p241_p4 = scmp.lt.s32.totalorder %s18_s13, %s18_s13 }
   0xb   :  { %p237_p3 = scmp.ne.s32.totalorder %s18_s13, %s236_s23  ;;  %p242_p5 = scmp.lt.s32.totalorder %s236_s23, %s236_s23 }
   0xd   :  { %p243_p6 = por %p242_p5, %p241_p4 }
   0xf   :  { %p244_p7 = pnand %p243_p6, %p237_p3 }
  0x11   :  { %247 = shalt.err (!%p244_p7)
}
  0x12   :  { %20 = dma.hbm_to_vmem [thread:$0]  %s400_s0, 128, %s18_s13, [#allocation3]  }
  0x13   :  { %s248_s28 = scalar_lea.hbm %s401_s1, 256 }
  0x14   :  { %p249_p8 = scmp.ne.s32.totalorder %s401_s1, %s248_s28  ;;  %p252_p9 = scmp.lt.u32.totalorder %s248_s28, %s401_s1 }
  0x16   :  { %p254_p10 = pnand %p252_p9, %p249_p8 }
  0x18   :  { %257 = shalt.err (!%p254_p10)
}
  0x19   :  { %s258_s6 = scalar_lea.vmem %s335_s15, 256  ;;  %p263_p12 = scmp.lt.s32.totalorder %s335_s15, %s335_s15 }
  0x1a   :  { %p259_p11 = scmp.ne.s32.totalorder %s335_s15, %s258_s6  ;;  %p264_p13 = scmp.lt.s32.totalorder %s258_s6, %s258_s6 }
  0x1c   :  { %p265_p0 = por %p264_p13, %p263_p12 }
  0x1e   :  { %p266_p1 = pnand %p265_p0, %p259_p11 }
  0x20   :  { %269 = shalt.err (!%p266_p1)
}
  0x21   :  { %s300_s0 = smov 64   ;;  %s301_s7 = smov 4  }
  0x22   :  { %32 = dma.hbm_to_vmem [thread:$0]  %s401_s1, 256, %s335_s15, [#allocation6], %s300_s0, %s300_s0, %s301_s7  }
  0x23   :  { %292 = dma.done.wait [#allocation3], 128  }
  0x24   :  { %293 = vsyncadd [#allocation3], 4294967168 }
  0x25   :  { %294 = dma.done.wait [#allocation6], 256  }
  0x26   :  { %295 = vsyncadd [#allocation6], 4294967040  ;;  %v302_v0 = vmov 0.0   ;;  %vm303_vm0 = vmmov 0   ;;  %v224_v1 = vld [vmem:[#allocation5] sm:$0xff]   ;;  %v225_v2 = vld [vmem:[#allocation5 + $0x8] sm:$0xff]  }
  0x27   :  { %199 = vmatprep.subr.bf16.mxu0 %v302_v0  ;;  %203 = vmatprep.mubr.msk.bf16.mxu0 %vm303_vm0, %v302_v0  ;;  %v42_v3 = vld [vmem:[#allocation2] sm:$0xff]  ;;  %vm67_vm1 = vcmask 261120   ;;  %vm112_vm2 = vcmask 60416   ;;  %s304_s1 = smov 104   ;;  %s305_s12 = smov 120  }
  0x28   :  { %200 = vmatpush3.bf16.msra.mxu0 %v224_v1  ;;  %v43_v4 = vpack.c.bf16 %v42_v3, %v42_v3  ;;  %v190_v5 = vld [vmem:[%s402_s2] ss:$0 sm:$0xff]  ;;  %s306_s13 = smov 96   ;;  %s307_s14 = smov 112  }
  0x29   :  { %201 = vmatprep.subr.bf16.mxu0 %v302_v0  ;;  %s308_s15 = smov 80   ;;  %s309_s2 = smov 88  }
  0x2a   :  { %s310_s16 = smov 72   ;;  %s311_s17 = smov 48  }
  0x2b   :  { %s312_s18 = smov 56   ;;  %s313_s19 = smov 40  }
  0x2c   :  { %202 = vmatpush3.bf16.msra.mxu0 %v225_v2  ;;  %s314_s20 = smov [#allocation7]  }
  0x2d   :  { %s177_s21 = sshll.u32 %s314_s20, 4  ;;  %s178_s21 = int_to_ptr.vmem [resolvable:$true] %s177_s21 }
  0x2e   :  { %s270_s22 = scalar_lea.vmem %s178_s21, 768  ;;  %p275_p3 = scmp.lt.s32.totalorder %s178_s21, %s178_s21 }
  0x2f   :  { %204 = vmatmul.mubr.msk.bf16.vlgmr.msra.gmra.mrb[0].mxu0 %vm67_vm1, %v43_v4  ;;  %p271_p2 = scmp.ne.s32.totalorder %s178_s21, %s270_s22  ;;  %p276_p4 = scmp.lt.s32.totalorder %s270_s22, %s270_s22 }
  0x31   :  { %p277_p5 = por %p276_p4, %p275_p3 }
  0x33   :  { %p278_p6 = pnand %p277_p5, %p271_p2 }
 0x102   :  { %v105_v6 = vpop.f32.mrb[0].mxu0 }
 0x103   :  { %v106_v7 = vadd.f32 %v190_v5, %v105_v6  ;;  %v205_v8 = vpop.f32.mrb[1].mxu0 }
 0x104   :  { %v108_v9 = vpop.f32.mrb[2].mxu0 }
 0x105   :  { %v111_v10 = vpack.c.bf16 %v106_v7, %v106_v7  ;;  %v206_v11 = vpop.f32.mrb[3].mxu0 }
 0x107   :  { %127 = vrot.lane.b32.xlu1 %v111_v10, %s304_s1  ;;  %117 = vrot.lane.b32.xlu0 %v111_v10, %s305_s12  ;;  %113 = vst.msk [vmem:[#allocation7] sm:$0xf] %vm112_vm2, %v111_v10 }
 0x10b   :  { %132 = vrot.lane.b32.xlu1 %v111_v10, %s306_s13  ;;  %122 = vrot.lane.b32.xlu0 %v111_v10, %s307_s14 }
 0x10f   :  { %142 = vrot.lane.b32.xlu1 %v111_v10, %s308_s15  ;;  %137 = vrot.lane.b32.xlu0 %v111_v10, %s309_s2 }
 0x113   :  { %152 = vrot.lane.b32.xlu1 %v111_v10, %s300_s0  ;;  %147 = vrot.lane.b32.xlu0 %v111_v10, %s310_s16 }
 0x117   :  { %162 = vrot.lane.b32.xlu1 %v111_v10, %s311_s17  ;;  %157 = vrot.lane.b32.xlu0 %v111_v10, %s312_s18 }
 0x11b   :  { %167 = vrot.lane.b32.xlu0 %v111_v10, %s313_s19 }
 0x179   :  { %v128_v12 = vpop.permute.xlu1 %127  ;;  %v118_v13 = vpop.permute.xlu0 %117 }
 0x17a   :  { %131 = vst.msk [vmem:[#allocation7 + $0xc] sm:$0xf] %vm112_vm2, %v128_v12  ;;  %121 = vst.msk [vmem:[#allocation7 + $0x4] sm:$0xf] %vm112_vm2, %v118_v13 }
 0x17d   :  { %v133_v14 = vpop.permute.xlu1 %132  ;;  %v123_v15 = vpop.permute.xlu0 %122 }
 0x17e   :  { %136 = vst.msk [vmem:[#allocation7 + $0x10] sm:$0xf] %vm112_vm2, %v133_v14  ;;  %126 = vst.msk [vmem:[#allocation7 + $0x8] sm:$0xf] %vm112_vm2, %v123_v15 }
 0x181   :  { %v143_v16 = vpop.permute.xlu1 %142  ;;  %v138_v17 = vpop.permute.xlu0 %137 }
 0x182   :  { %146 = vst.msk [vmem:[#allocation7 + $0x18] sm:$0xf] %vm112_vm2, %v143_v16  ;;  %141 = vst.msk [vmem:[#allocation7 + $0x14] sm:$0xf] %vm112_vm2, %v138_v17 }
 0x185   :  { %v153_v18 = vpop.permute.xlu1 %152  ;;  %v148_v19 = vpop.permute.xlu0 %147 }
 0x186   :  { %156 = vst.msk [vmem:[#allocation7 + $0x20] sm:$0xf] %vm112_vm2, %v153_v18  ;;  %151 = vst.msk [vmem:[#allocation7 + $0x1c] sm:$0xf] %vm112_vm2, %v148_v19 }
 0x189   :  { %v163_v20 = vpop.permute.xlu1 %162  ;;  %v158_v21 = vpop.permute.xlu0 %157 }
 0x18a   :  { %166 = vst.msk [vmem:[#allocation7 + $0x28] sm:$0xf] %vm112_vm2, %v163_v20  ;;  %161 = vst.msk [vmem:[#allocation7 + $0x24] sm:$0xf] %vm112_vm2, %v158_v21 }
 0x18d   :  { %v168_v22 = vpop.permute.xlu0 %167 }
 0x18e   :  { %171 = vst.msk [vmem:[#allocation7 + $0x2c] sm:$0xf] %vm112_vm2, %v168_v22 }
 0x18f   :  { %281 = shalt.err (!%p278_p6)
}
 0x190   :  { %s282_s25 = scalar_lea.hbm %s403_s3, 768 }
 0x191   :  { %p283_p7 = scmp.ne.s32.totalorder %s403_s3, %s282_s25  ;;  %p286_p8 = scmp.lt.u32.totalorder %s282_s25, %s403_s3 }
 0x193   :  { %p288_p9 = pnand %p286_p8, %p283_p7 }
 0x195   :  { %291 = shalt.err (!%p288_p9)
}
 0x196   :  { %183 = dma.vmem_to_hbm [thread:$0]  %s178_s21, 768, %s403_s3, [#allocation4], %s300_s0, %s300_s0, %s301_s7  }
 0x197   :  { %296 = dma.done.wait [#allocation4], 768  }
 0x198   :  { %297 = vsyncadd [#allocation4], 4294966528 }
 0x199   :  { %187 = vsyncpa [#allocation3], 1 }
 0x19a   :  { %188 = vsyncpa [#allocation6], 1 }
 0x19b   :  { %189 = vsyncpa [#allocation4], 1 }

</bundles_post_ra>
